<compile_context>
chip_gen: v7x
topology: tpu7x:2x2x1
jax: 0.10.0
libtpu: 0.0.40
codegen_flags: <defaults>
</compile_context>

<pallas_src>
import jax
import jax.numpy as jnp
from jax.experimental import pallas as pl
from jax.experimental.pallas import tpu as pltpu


# ---------------------------------------------------------------------------
# Generation-aware VMEM budgets.
# ---------------------------------------------------------------------------
def _phys_vmem_bytes():
    try:
        return int(pltpu.get_tpu_info().vmem_capacity_bytes)
    except Exception:
        return 64 * 1024 * 1024          # conservative (v7x-sized) fallback


_PHYS_VMEM = _phys_vmem_bytes()


def _budgets(itemsize):
    """Returns (vmem_limit_bytes, max_norm_tile_elems, max_stats_tile_elems)."""
    if _PHYS_VMEM >= 96 * 1024 * 1024:   # v5e / v6e: 128 MiB physical VMEM
        vmem_limit = 64 * 1024 * 1024
        tile_budget = 32 * 1024 * 1024
    else:                                 # v7x: 64 MiB physical VMEM
        vmem_limit = 40 * 1024 * 1024
        tile_budget = 20 * 1024 * 1024
    # Bytes in flight per tile element:
    #   normalize : x in (2 bufs) + y out (2 bufs) + ~8 B f32 intermediates
    #   stats     : x in (2 bufs)                  + ~8 B f32 intermediates
    bytes_norm = 4 * itemsize + 8
    bytes_stats = 2 * itemsize + 8
    return vmem_limit, tile_budget // bytes_norm, tile_budget // bytes_stats


def _round_up(x, m):
    return -(-x // m) * m


def _row_granule(dtype):
    # sublane packing granularity: f32 -> 8, bf16/f16 -> 16, int8/fp8 -> 32
    return max(8, 32 // jnp.dtype(dtype).itemsize)


def _pick_tm(m_pad0, cap_elems, granule):
    """Lane tile: largest multiple of 128 with padding waste <= M/16."""
    tm_cap = min(8192, max(128, (cap_elems // granule) // 128 * 128))
    for t in (8192, 4096, 2048, 1024, 512, 256, 128):
        if t > tm_cap:
            continue
        waste = (-m_pad0) % t
        if waste * 16 <= m_pad0:
            return t, m_pad0 + waste
    return 128, _round_up(m_pad0, 128)


def _pick_rows(nc_pad, granule, max_rows):
    """Largest divisor of nc_pad that is a multiple of `granule` and fits."""
    best = granule
    r = granule
    while r <= nc_pad:
        if nc_pad % r == 0 and r <= max_rows:
            best = r
        r += granule
    return best


# ---------------------------------------------------------------------------
# Kernel 1: per-row sum / sum-of-squares, accumulated over M-chunks.
# Output block (TR, 2): col 0 = sum(x), col 1 = sum(x^2).  Finalized in glue.
# ---------------------------------------------------------------------------
def _stats_kernel(x_ref, out_ref):
    k = pl.program_id(2)

    @pl.when(k == 0)
    def _():
        out_ref[...] = jnp.zeros_like(out_ref)

    x = x_ref[...].astype(jnp.float32)                      # (TR, TM)
    s = jnp.sum(x, axis=-1, keepdims=True)                  # (TR, 1)
    q = jnp.sum(x * x, axis=-1, keepdims=True)               # (TR, 1)
    out_ref[...] += jnp.concatenate([s, q], axis=-1)          # (TR, 2)


# ---------------------------------------------------------------------------
# Kernel 2: y = x * scale + shift   (normalization + affine pre-folded).
# ---------------------------------------------------------------------------
def _norm_kernel(x_ref, ss_ref, o_ref):
    ss = ss_ref[...]                                          # (TR, 2)
    scale = ss[:, 0:1]
    shift = ss[:, 1:2]
    o_ref[...] = (x_ref[...].astype(jnp.float32) * scale + shift).astype(o_ref.dtype)


# ---------------------------------------------------------------------------
# Public forward.
# ---------------------------------------------------------------------------
@jax.jit
def switch_norm_3d(x, weight, bias, mean_weight, var_weight, eps=1e-5):
    """SwitchNorm3d forward (training-mode batch statistics).

    x: (N, C, D, H, W) float32 / bfloat16
    weight, bias: (1, C, 1, 1, 1)
    mean_weight, var_weight: (3,)
    """
    N, C, D, H, W = x.shape
    M = D * H * W
    NC = N * C
    itemsize = jnp.dtype(x.dtype).itemsize
    g = _row_granule(x.dtype)

    vmem_limit, cap_norm, cap_stats = _budgets(itemsize)

    nc_pad = _round_up(NC, g)
    m_pad0 = _round_up(M, 128)
    tm_n, m_pad = _pick_tm(m_pad0, cap_norm, g)
    tr_n = _pick_rows(nc_pad, g, max(g, cap_norm // tm_n))

    # Stats kernel only keeps x double-buffered -> ~2x tile area of kernel 2.
    tr_s = _pick_rows(nc_pad, g, max(g, cap_stats // tm_n))
    chunks = m_pad // tm_n
    if nc_pad // tr_s == 1 and chunks >= 2 and chunks % 2 == 0:
        # Small N*C: split the M reduction over a leading parallel axis so
        # both v7x TensorCores get work; partials combined in the glue below.
        ns, tm_s = 2, tm_n
    else:
        ns = 1
        tm_s = (2 * tm_n if (m_pad % (2 * tm_n) == 0
                             and tr_s * 2 * tm_n <= cap_stats) else tm_n)
    cps = m_pad // tm_s // ns            # M-chunks per split

    # Native-dtype 2-D view; zero-pad (zeros are exact for sum / sum-sq).
    x2 = x.reshape(NC, M)
    if (nc_pad, m_pad) != (NC, M):
        x2 = jnp.pad(x2, ((0, nc_pad - NC), (0, m_pad - M)))

    # ---- Kernel 1: per-(n,c) sum / sum-of-squares --------------------------
    partials = pl.pallas_call(
        _stats_kernel,
        out_shape=jax.ShapeDtypeStruct((ns, nc_pad, 2), jnp.float32),
        grid=(ns, nc_pad // tr_s, cps),
        in_specs=[pl.BlockSpec((tr_s, tm_s),
                               lambda p, i, k, _c=cps: (i, p * _c + k))],
        out_specs=pl.BlockSpec((None, tr_s, 2), lambda p, i, k: (p, i, 0)),
        compiler_params=pltpu.CompilerParams(
            dimension_semantics=("parallel", "parallel", "arbitrary"),
            vmem_limit_bytes=vmem_limit),
    )(x2)

    # ---- cheap cross-row mixing in plain JAX (O(N*C) scalars) --------------
    sums = jnp.sum(partials, axis=0)[:NC]                    # (NC, 2)
    m = jnp.float32(M)
    mean_flat = sums[:, 0] / m
    denom = jnp.float32(max(M - 1, 1))                        # torch unbiased var
    var_flat = jnp.maximum((sums[:, 1] - m * mean_flat * mean_flat) / denom, 0.0)

    mean_in = mean_flat.reshape(N, C, 1)
    var_in = var_flat.reshape(N, C, 1)

    mean_ln = jnp.mean(mean_in, axis=1, keepdims=True)              # (N,1,1)
    temp = var_in + mean_in ** 2
    var_ln = jnp.mean(temp, axis=1, keepdims=True) - mean_ln ** 2   # (N,1,1)

    mean_bn = jnp.mean(mean_in, axis=0, keepdims=True)              # (1,C,1)
    var_bn = jnp.mean(temp, axis=0, keepdims=True) - mean_bn ** 2   # (1,C,1)

    mw = jax.nn.softmax(mean_weight.astype(jnp.float32))
    vw = jax.nn.softmax(var_weight.astype(jnp.float32))

    mean_mix = mw[0] * mean_in + mw[1] * mean_ln + mw[2] * mean_bn  # (N,C,1)
    var_mix = vw[0] * var_in + vw[1] * var_ln + vw[2] * var_bn      # (N,C,1)

    gamma = jnp.broadcast_to(weight.reshape(1, C, 1).astype(jnp.float32), (N, C, 1))
    beta = jnp.broadcast_to(bias.reshape(1, C, 1).astype(jnp.float32), (N, C, 1))

    # fold normalize + affine into per-row scale/shift (O(N*C) work)
    scale = gamma * jax.lax.rsqrt(jnp.maximum(var_mix, 0.0) + eps)
    shift = beta - mean_mix * scale
    ss = jnp.concatenate([scale, shift], axis=-1).reshape(NC, 2)
    if nc_pad != NC:
        ss = jnp.pad(ss, ((0, nc_pad - NC), (0, 0)))

    # ---- Kernel 2: y = x * scale + shift ------------------------------------
    y2 = pl.pallas_call(
        _norm_kernel,
        out_shape=jax.ShapeDtypeStruct((nc_pad, m_pad), x.dtype),
        grid=(nc_pad // tr_n, m_pad // tm_n),
        in_specs=[pl.BlockSpec((tr_n, tm_n), lambda i, j: (i, j)),
                  pl.BlockSpec((tr_n, 2), lambda i, j: (i, 0))],
        out_specs=pl.BlockSpec((tr_n, tm_n), lambda i, j: (i, j)),
        compiler_params=pltpu.CompilerParams(
            dimension_semantics=("parallel", "parallel"),
            vmem_limit_bytes=vmem_limit),
    )(x2, ss)

    return y2[:NC, :M].reshape(N, C, D, H, W)


# ---------------------------------------------------------------------------
# Pure-JAX reference (mirrors the PyTorch forward, training mode).
# ---------------------------------------------------------------------------
def _reference(x, weight, bias, mean_weight, var_weight, eps=1e-5):
    N, C, D, H, W = x.shape
    xv = x.astype(jnp.float32).reshape(N, C, -1)
    M = xv.shape[-1]
    mean_in = jnp.mean(xv, axis=-1, keepdims=True)
    var_in = jnp.sum((xv - mean_in) ** 2, axis=-1, keepdims=True) / max(M - 1, 1)
    mean_ln = jnp.mean(mean_in, axis=1, keepdims=True)
    temp = var_in + mean_in ** 2
    var_ln = jnp.mean(temp, axis=1, keepdims=True) - mean_ln ** 2
    mean_bn = jnp.mean(mean_in, axis=0, keepdims=True)
    var_bn = jnp.mean(temp, axis=0, keepdims=True) - mean_bn ** 2
    mw = jax.nn.softmax(mean_weight.astype(jnp.float32))
    vw = jax.nn.softmax(var_weight.astype(jnp.float32))
    mean = mw[0] * mean_in + mw[1] * mean_ln + mw[2] * mean_bn
    var = vw[0] * var_in + vw[1] * var_ln + vw[2] * var_bn
    xn = (xv - mean) / jnp.sqrt(var + eps)
    xn = xn.reshape(N, C, D, H, W)
    return xn * weight.astype(jnp.float32) + bias.astype(jnp.float32)


if __name__ == "__main__":
    key = jax.random.PRNGKey(0)
    kx, kw, kb, km, kv = jax.random.split(key, 5)

    def make_params(C):
        weight = 1.0 + 0.1 * jax.random.normal(kw, (1, C, 1, 1, 1), jnp.float32)
        bias = 0.1 * jax.random.normal(kb, (1, C, 1, 1, 1), jnp.float32)
        mean_weight = jax.random.normal(km, (3,), jnp.float32)
        var_weight = jax.random.normal(kv, (3,), jnp.float32)
        return weight, bias, mean_weight, var_weight

    cases = [
        # (shape, dtype, atol, rtol)
        ((2, 8, 8, 16, 32), jnp.float32, 5e-4, 5e-4),     # aligned sizes
        ((1, 8, 16, 32, 32), jnp.float32, 5e-4, 5e-4),    # small N*C -> split-M stats
        ((2, 3, 5, 7, 9), jnp.float32, 5e-4, 5e-4),       # row + lane padding path
        ((2, 8, 8, 16, 32), jnp.bfloat16, 5e-2, 5e-2),    # native sub-f32 streaming
    ]
    for shape, dtype, atol, rtol in cases:
        N, C, D, H, W = shape
        x = jax.random.normal(kx, shape, jnp.float32).astype(dtype)
        weight, bias, mean_weight, var_weight = make_params(C)

        y = switch_norm_3d(x, weight, bias, mean_weight, var_weight)
        y = jax.block_until_ready(y)

        y_ref = _reference(x, weight, bias, mean_weight, var_weight)
        assert y.shape == shape and y.dtype == jnp.dtype(dtype)
        yf = y.astype(jnp.float32)
        assert bool(jnp.all(jnp.isfinite(yf)))
        assert jnp.allclose(yf, y_ref, atol=atol, rtol=rtol), (shape, dtype)

    print("KERNEL_OK")
</pallas_src>

<mosaic_0001>
module attributes {stable_mosaic.version = 11 : i64} {
  func.func @_stats_kernel(%arg0: i32, %arg1: i32, %arg2: i32, %arg3: memref<16x4096xf32, #tpu.memory_space<vmem>>, %arg4: memref<1x16x2xf32, #tpu.memory_space<vmem>>) attributes {dimension_semantics = [#tpu.dimension_semantics<parallel>, #tpu.dimension_semantics<parallel>, #tpu.dimension_semantics<arbitrary>], iteration_bounds = array<i64: 1, 1, 1>, scalar_prefetch = 0 : i64, scratch_operands = 0 : i64, tpu.core_type = #tpu.core_type<tc>, window_params = [{transform_indices = @transform_0, window_bounds = array<i64: 16, 4096>}, {transform_indices = @transform_1, window_bounds = array<i64: 1, 16, 2>}]} {
    %c0_i32 = arith.constant 0 : i32
    %0 = arith.cmpi eq, %arg2, %c0_i32 : i32
    %1 = arith.extui %0 : i1 to i32
    %c0_i32_0 = arith.constant 0 : i32
    %2 = arith.cmpi ne, %1, %c0_i32_0 : i32
    scf.if %2 {
      %cst_9 = arith.constant 0.000000e+00 : f32
      %16 = vector.broadcast %cst_9 : f32 to vector<16x2xf32>
      %c0_10 = arith.constant 0 : index
      %c0_11 = arith.constant 0 : index
      %c0_12 = arith.constant 0 : index
      %17 = vector.load %arg4[%c0_10, %c0_11, %c0_12] : memref<1x16x2xf32, #tpu.memory_space<vmem>>, vector<1x16x2xf32>
      %18 = vector.shape_cast %17 : vector<1x16x2xf32> to vector<16x2xf32>
      %19 = vector.shape_cast %16 : vector<16x2xf32> to vector<1x16x2xf32>
      tpu.vector_store %arg4[%c0_10, %c0_11, %c0_12], %19 {strides = array<i32>} : memref<1x16x2xf32, #tpu.memory_space<vmem>>, vector<1x16x2xf32>,
    } else {
    }
    %c0 = arith.constant 0 : index
    %c0_1 = arith.constant 0 : index
    %3 = vector.load %arg3[%c0, %c0_1] : memref<16x4096xf32, #tpu.memory_space<vmem>>, vector<16x4096xf32>
    %cst = arith.constant dense<0.000000e+00> : vector<16xf32>
    %4 = vector.multi_reduction <add>, %3, %cst [1] : vector<16x4096xf32> to vector<16xf32>
    %5 = vector.shape_cast %4 : vector<16xf32> to vector<16x1xf32>
    %6 = arith.mulf %3, %3 : vector<16x4096xf32>
    %cst_2 = arith.constant dense<0.000000e+00> : vector<16xf32>
    %7 = vector.multi_reduction <add>, %6, %cst_2 [1] : vector<16x4096xf32> to vector<16xf32>
    %8 = vector.shape_cast %7 : vector<16xf32> to vector<16x1xf32>
    %c0_3 = arith.constant 0 : index
    %c0_4 = arith.constant 0 : index
    %c0_5 = arith.constant 0 : index
    %9 = vector.load %arg4[%c0_3, %c0_4, %c0_5] : memref<1x16x2xf32, #tpu.memory_space<vmem>>, vector<1x16x2xf32>
    %10 = vector.shape_cast %9 : vector<1x16x2xf32> to vector<16x2xf32>
    %11 = tpu.concatenate %5, %8 in 1 : vector<16x1xf32>, vector<16x1xf32> -> vector<16x2xf32>
    %12 = arith.addf %10, %11 : vector<16x2xf32>
    %c0_6 = arith.constant 0 : index
    %c0_7 = arith.constant 0 : index
    %c0_8 = arith.constant 0 : index
    %13 = vector.load %arg4[%c0_6, %c0_7, %c0_8] : memref<1x16x2xf32, #tpu.memory_space<vmem>>, vector<1x16x2xf32>
    %14 = vector.shape_cast %13 : vector<1x16x2xf32> to vector<16x2xf32>
    %15 = vector.shape_cast %12 : vector<16x2xf32> to vector<1x16x2xf32>
    tpu.vector_store %arg4[%c0_6, %c0_7, %c0_8], %15 {strides = array<i32>} : memref<1x16x2xf32, #tpu.memory_space<vmem>>, vector<1x16x2xf32>,
    return
  }
  func.func @transform_0(%arg0: i32, %arg1: i32, %arg2: i32) -> (i32, i32) {
    %c1_i32 = arith.constant 1 : i32
    %0 = arith.muli %arg0, %c1_i32 : i32
    %1 = arith.addi %0, %arg2 : i32
    %c0_i32 = arith.constant 0 : i32
    return %arg1, %1 : i32, i32
  }
  func.func @transform_1(%arg0: i32, %arg1: i32, %arg2: i32) -> (i32, i32, i32) {
    %c0_i32 = arith.constant 0 : i32
    %c0_i32_0 = arith.constant 0 : i32
    return %arg0, %arg1, %c0_i32 : i32, i32, i32
  }
}

module attributes {stable_mosaic.version = 11 : i64} {
  func.func @_norm_kernel(%arg0: i32, %arg1: i32, %arg2: memref<16x4096xf32, #tpu.memory_space<vmem>>, %arg3: memref<16x2xf32, #tpu.memory_space<vmem>>, %arg4: memref<16x4096xf32, #tpu.memory_space<vmem>>) attributes {dimension_semantics = [#tpu.dimension_semantics<parallel>, #tpu.dimension_semantics<parallel>], iteration_bounds = array<i64: 1, 1>, scalar_prefetch = 0 : i64, scratch_operands = 0 : i64, tpu.core_type = #tpu.core_type<tc>, window_params = [{transform_indices = @transform_0, window_bounds = array<i64: 16, 4096>}, {transform_indices = @transform_1, window_bounds = array<i64: 16, 2>}, {transform_indices = @transform_2, window_bounds = array<i64: 16, 4096>}]} {
    %c0 = arith.constant 0 : index
    %c0_0 = arith.constant 0 : index
    %0 = vector.load %arg3[%c0, %c0_0] : memref<16x2xf32, #tpu.memory_space<vmem>>, vector<16x2xf32>
    %1 = vector.extract_strided_slice %0 {offsets = [0, 0], sizes = [16, 1], strides = [1, 1]} : vector<16x2xf32> to vector<16x1xf32>
    %2 = vector.extract_strided_slice %0 {offsets = [0, 1], sizes = [16, 1], strides = [1, 1]} : vector<16x2xf32> to vector<16x1xf32>
    %c0_1 = arith.constant 0 : index
    %c0_2 = arith.constant 0 : index
    %3 = vector.load %arg2[%c0_1, %c0_2] : memref<16x4096xf32, #tpu.memory_space<vmem>>, vector<16x4096xf32>
    %4 = vector.broadcast %1 : vector<16x1xf32> to vector<16x4096xf32>
    %5 = arith.mulf %3, %4 : vector<16x4096xf32>
    %6 = vector.broadcast %2 : vector<16x1xf32> to vector<16x4096xf32>
    %7 = arith.addf %5, %6 : vector<16x4096xf32>
    %c0_3 = arith.constant 0 : index
    %c0_4 = arith.constant 0 : index
    %8 = vector.load %arg4[%c0_3, %c0_4] : memref<16x4096xf32, #tpu.memory_space<vmem>>, vector<16x4096xf32>
    tpu.vector_store %arg4[%c0_3, %c0_4], %7 {strides = array<i32>} : memref<16x4096xf32, #tpu.memory_space<vmem>>, vector<16x4096xf32>,
    return
  }
  func.func @transform_0(%arg0: i32, %arg1: i32) -> (i32, i32) {
    %c0_i32 = arith.constant 0 : i32
    return %arg0, %arg1 : i32, i32
  }
  func.func @transform_1(%arg0: i32, %arg1: i32) -> (i32, i32) {
    %c0_i32 = arith.constant 0 : i32
    %c0_i32_0 = arith.constant 0 : i32
    return %arg0, %c0_i32 : i32, i32
  }
  func.func @transform_2(%arg0: i32, %arg1: i32) -> (i32, i32) {
    %c0_i32 = arith.constant 0 : i32
    return %arg0, %arg1 : i32, i32
  }
}

</mosaic_0001>

<bundles_post_ra>
// kernel: switch_norm_3d.3
= control target key start
LH: loop header
LB: loop body
LE: loop exit
PB: predicated region body
PF: predicated region fallthrough
CT: control target
= control target key end

     0   :  { %v296_v0 = vmov 1   ;;  %v297_v1 = vmov 0   ;;  %s783_s1 = inlined_call_operand.vmem [shape: f32[16,2], index: 1, kind: input, shape index: {}]   ;;  %s784_s0 = inlined_call_operand.vmem [shape: f32[16,4096], index: 0, kind: input, shape index: {}]   ;;  %s785_s2 = inlined_call_operand.vmem [shape: f32[16,4096], index: 2, kind: output, shape index: {}]  }
   0x1   :  { %294 = vset.pattern.permute.xlu1 %v296_v0  ;;  %293 = vset.pattern.permute.xlu0 %v297_v1  ;;  %v11_v2 = vld [vmem:[%s783_s1] sm:$0xff]  ;;  %v12_v3 = vld [vmem:[%s783_s1 + $0x8] sm:$0xff]  ;;  %v15_v6 = vld [vmem:[%s784_s0 + $0x10] sm:$0xff] }
   0x2   :  { %152 = vperm.xlu1 %294, %v11_v2   ;;  %79 = vperm.xlu0 %293, %v11_v2   ;;  %v13_v4 = vld [vmem:[%s784_s0] sm:$0xff]  ;;  %v14_v5 = vld [vmem:[%s784_s0 + $0x8] sm:$0xff]  ;;  %v16_v7 = vld [vmem:[%s784_s0 + $0x18] sm:$0xff] }
   0x3   :  { %v17_v8 = vld [vmem:[%s784_s0 + $0x20] sm:$0xff]  ;;  %v18_v9 = vld [vmem:[%s784_s0 + $0x28] sm:$0xff]  ;;  %v19_v10 = vld [vmem:[%s784_s0 + $0x30] sm:$0xff] }
   0x4   :  { %v20_v11 = vld [vmem:[%s784_s0 + $0x38] sm:$0xff]  ;;  %v21_v12 = vld [vmem:[%s784_s0 + $0x40] sm:$0xff]  ;;  %v22_v13 = vld [vmem:[%s784_s0 + $0x48] sm:$0xff] }
   0x5   :  { %v23_v14 = vld [vmem:[%s784_s0 + $0x50] sm:$0xff]  ;;  %v24_v15 = vld [vmem:[%s784_s0 + $0x58] sm:$0xff]  ;;  %v25_v16 = vld [vmem:[%s784_s0 + $0x60] sm:$0xff] }
   0x6   :  { %156 = vperm.xlu1 %294, %v12_v3   ;;  %84 = vperm.xlu0 %293, %v12_v3   ;;  %v26_v17 = vld [vmem:[%s784_s0 + $0x68] sm:$0xff]  ;;  %v27_v19 = vld [vmem:[%s784_s0 + $0x70] sm:$0xff]  ;;  %v28_v20 = vld [vmem:[%s784_s0 + $0x78] sm:$0xff] }
   0x7   :  { %v29_v21 = vld [vmem:[%s784_s0 + $0x80] sm:$0xff]  ;;  %v30_v22 = vld [vmem:[%s784_s0 + $0x88] sm:$0xff]  ;;  %v31_v23 = vld [vmem:[%s784_s0 + $0x90] sm:$0xff] }
   0x8   :  { %v32_v24 = vld [vmem:[%s784_s0 + $0x98] sm:$0xff]  ;;  %v33_v29 = vld [vmem:[%s784_s0 + $0xa0] sm:$0xff]  ;;  %v34_v30 = vld [vmem:[%s784_s0 + $0xa8] sm:$0xff] }
   0x9   :  { %v35_v31 = vld [vmem:[%s784_s0 + $0xb0] sm:$0xff]  ;;  %v36_v36 = vld [vmem:[%s784_s0 + $0xb8] sm:$0xff]  ;;  %v37_v37 = vld [vmem:[%s784_s0 + $0xc0] sm:$0xff] }
   0xa   :  { %295 = vset.pattern.permute.xlu0 %v296_v0  ;;  %v38_v38 = vld [vmem:[%s784_s0 + $0xc8] sm:$0xff]  ;;  %v39_v43 = vld [vmem:[%s784_s0 + $0xd0] sm:$0xff]  ;;  %v40_v44 = vld [vmem:[%s784_s0 + $0xd8] sm:$0xff] }
   0xb   :  { %v41_v45 = vld [vmem:[%s784_s0 + $0xe0] sm:$0xff]  ;;  %v42_v50 = vld [vmem:[%s784_s0 + $0xe8] sm:$0xff]  ;;  %v43_v51 = vld [vmem:[%s784_s0 + $0xf0] sm:$0xff] }
   0xc   :  { %v44_v52 = vld [vmem:[%s784_s0 + $0xf8] sm:$0xff] }
  0x81   :  { %v80_v18 = vpop.permute.xlu0 %79  ;;  %v415_v1 = vpop.permute.xlu1 %152 }
  0x82   :  { %v87_v25 = vmul.f32 %v80_v18, %v13_v4  ;;  %v88_v26 = vmul.f32 %v80_v18, %v14_v5  ;;  %v89_v27 = vmul.f32 %v80_v18, %v15_v6  ;;  %v90_v28 = vmul.f32 %v80_v18, %v16_v7 }
  0x83   :  { %v91_v32 = vmul.f32 %v80_v18, %v17_v8  ;;  %v92_v33 = vmul.f32 %v80_v18, %v18_v9  ;;  %v93_v34 = vmul.f32 %v80_v18, %v19_v10  ;;  %v94_v35 = vmul.f32 %v80_v18, %v20_v11 }
  0x84   :  { %v95_v39 = vmul.f32 %v80_v18, %v21_v12  ;;  %v96_v40 = vmul.f32 %v80_v18, %v22_v13  ;;  %v97_v41 = vmul.f32 %v80_v18, %v23_v14  ;;  %v98_v42 = vmul.f32 %v80_v18, %v24_v15 }
  0x85   :  { %v99_v46 = vmul.f32 %v80_v18, %v25_v16  ;;  %v100_v47 = vmul.f32 %v80_v18, %v26_v17  ;;  %v101_v48 = vmul.f32 %v80_v18, %v27_v19  ;;  %v102_v49 = vmul.f32 %v80_v18, %v28_v20 }
  0x86   :  { %v103_v53 = vmul.f32 %v80_v18, %v29_v21  ;;  %v104_v54 = vmul.f32 %v80_v18, %v30_v22  ;;  %v105_v55 = vmul.f32 %v80_v18, %v31_v23  ;;  %v106_v56 = vmul.f32 %v80_v18, %v32_v24  ;;  %v45_v22 = vld [vmem:[%s784_s0 + $0x100] sm:$0xff]  ;;  %v46_v23 = vld [vmem:[%s784_s0 + $0x108] sm:$0xff]  ;;  %v47_v24 = vld [vmem:[%s784_s0 + $0x110] sm:$0xff] }
  0x87   :  { %v107_v57 = vmul.f32 %v80_v18, %v33_v29  ;;  %v108_v58 = vmul.f32 %v80_v18, %v34_v30  ;;  %v109_v59 = vmul.f32 %v80_v18, %v35_v31  ;;  %v110_v60 = vmul.f32 %v80_v18, %v36_v36  ;;  %v49_v30 = vld [vmem:[%s784_s0 + $0x120] sm:$0xff]  ;;  %v50_v31 = vld [vmem:[%s784_s0 + $0x128] sm:$0xff] }
  0x88   :  { %v111_v61 = vmul.f32 %v80_v18, %v37_v37  ;;  %v112_v62 = vmul.f32 %v80_v18, %v38_v38  ;;  %v113_v63 = vmul.f32 %v80_v18, %v39_v43  ;;  %v114_v0 = vmul.f32 %v80_v18, %v40_v44  ;;  %v521_v38 = vpop.permute.xlu0 %84 }
  0x89   :  { %v417_v2 = vmul.f32 %v80_v18, %v41_v45  ;;  %v419_v3 = vmul.f32 %v80_v18, %v42_v50  ;;  %v421_v4 = vmul.f32 %v80_v18, %v43_v51  ;;  %v423_v5 = vmul.f32 %v80_v18, %v44_v52 }
  0x8a   :  { %v159_v6 = vadd.f32 %v415_v1, %v87_v25  ;;  %v160_v7 = vadd.f32 %v415_v1, %v88_v26  ;;  %v161_v8 = vadd.f32 %v415_v1, %v89_v27  ;;  %v162_v9 = vadd.f32 %v415_v1, %v90_v28  ;;  %v48_v25 = vld [vmem:[%s784_s0 + $0x118] sm:$0xff] }
  0x8b   :  { %v163_v10 = vadd.f32 %v415_v1, %v91_v32  ;;  %v164_v11 = vadd.f32 %v415_v1, %v92_v33  ;;  %v165_v12 = vadd.f32 %v415_v1, %v93_v34  ;;  %v166_v13 = vadd.f32 %v415_v1, %v94_v35  ;;  %v51_v32 = vld [vmem:[%s784_s0 + $0x130] sm:$0xff]  ;;  %v52_v33 = vld [vmem:[%s784_s0 + $0x138] sm:$0xff] }
  0x8c   :  { %v167_v14 = vadd.f32 %v415_v1, %v95_v39  ;;  %v168_v15 = vadd.f32 %v415_v1, %v96_v40  ;;  %v169_v16 = vadd.f32 %v415_v1, %v97_v41  ;;  %v170_v17 = vadd.f32 %v415_v1, %v98_v42  ;;  %223 = vst [vmem:[%s785_s2] sm:$0xff] %v159_v6  ;;  %v53_v39 = vld [vmem:[%s784_s0 + $0x140] sm:$0xff]  ;;  %v54_v40 = vld [vmem:[%s784_s0 + $0x148] sm:$0xff]  ;;  %v55_v41 = vld [vmem:[%s784_s0 + $0x150] sm:$0xff] }
  0x8d   :  { %224 = vst [vmem:[%s785_s2 + $0x8] sm:$0xff] %v160_v7  ;;  %225 = vst [vmem:[%s785_s2 + $0x10] sm:$0xff] %v161_v8  ;;  %v171_v18 = vadd.f32 %v415_v1, %v99_v46  ;;  %v172_v19 = vadd.f32 %v415_v1, %v100_v47  ;;  %v173_v20 = vadd.f32 %v415_v1, %v101_v48  ;;  %v56_v46 = vld [vmem:[%s784_s0 + $0x158] sm:$0xff]  ;;  %v57_v47 = vld [vmem:[%s784_s0 + $0x160] sm:$0xff] }
  0x8e   :  { %226 = vst [vmem:[%s785_s2 + $0x18] sm:$0xff] %v162_v9  ;;  %v174_v21 = vadd.f32 %v415_v1, %v102_v49  ;;  %227 = vst [vmem:[%s785_s2 + $0x20] sm:$0xff] %v163_v10  ;;  %v175_v26 = vadd.f32 %v415_v1, %v103_v53  ;;  %v176_v27 = vadd.f32 %v415_v1, %v104_v54  ;;  %v58_v48 = vld [vmem:[%s784_s0 + $0x168] sm:$0xff]  ;;  %v59_v53 = vld [vmem:[%s784_s0 + $0x170] sm:$0xff] }
  0x8f   :  { %228 = vst [vmem:[%s785_s2 + $0x28] sm:$0xff] %v164_v11  ;;  %229 = vst [vmem:[%s785_s2 + $0x30] sm:$0xff] %v165_v12  ;;  %v177_v28 = vadd.f32 %v415_v1, %v105_v55  ;;  %v178_v29 = vadd.f32 %v415_v1, %v106_v56  ;;  %v179_v34 = vadd.f32 %v415_v1, %v107_v57  ;;  %v60_v54 = vld [vmem:[%s784_s0 + $0x178] sm:$0xff]  ;;  %v61_v55 = vld [vmem:[%s784_s0 + $0x180] sm:$0xff] }
  0x90   :  { %230 = vst [vmem:[%s785_s2 + $0x38] sm:$0xff] %v166_v13  ;;  %231 = vst [vmem:[%s785_s2 + $0x40] sm:$0xff] %v167_v14  ;;  %v180_v35 = vadd.f32 %v415_v1, %v108_v58  ;;  %v181_v36 = vadd.f32 %v415_v1, %v109_v59  ;;  %v182_v37 = vadd.f32 %v415_v1, %v110_v60  ;;  %v62_v56 = vld [vmem:[%s784_s0 + $0x188] sm:$0xff]  ;;  %v63_v57 = vld [vmem:[%s784_s0 + $0x190] sm:$0xff] }
  0x91   :  { %232 = vst [vmem:[%s785_s2 + $0x48] sm:$0xff] %v168_v15  ;;  %233 = vst [vmem:[%s785_s2 + $0x50] sm:$0xff] %v169_v16  ;;  %v183_v42 = vadd.f32 %v415_v1, %v111_v61  ;;  %v184_v43 = vadd.f32 %v415_v1, %v112_v62  ;;  %v185_v44 = vadd.f32 %v415_v1, %v113_v63  ;;  %v64_v58 = vld [vmem:[%s784_s0 + $0x198] sm:$0xff]  ;;  %v65_v63 = vld [vmem:[%s784_s0 + $0x1a0] sm:$0xff] }
  0x92   :  { %234 = vst [vmem:[%s785_s2 + $0x58] sm:$0xff] %v170_v17  ;;  %235 = vst [vmem:[%s785_s2 + $0x60] sm:$0xff] %v171_v18  ;;  %v186_v45 = vadd.f32 %v415_v1, %v114_v0  ;;  %v187_v49 = vadd.f32 %v415_v1, %v417_v2  ;;  %v188_v50 = vadd.f32 %v415_v1, %v419_v3  ;;  %v66_v0 = vld [vmem:[%s784_s0 + $0x1a8] sm:$0xff]  ;;  %v68_v6 = vld [vmem:[%s784_s0 + $0x1b8] sm:$0xff] }
  0x93   :  { %236 = vst [vmem:[%s785_s2 + $0x68] sm:$0xff] %v172_v19  ;;  %237 = vst [vmem:[%s785_s2 + $0x70] sm:$0xff] %v173_v20  ;;  %v189_v51 = vadd.f32 %v415_v1, %v421_v4  ;;  %v190_v52 = vadd.f32 %v415_v1, %v423_v5  ;;  %v119_v59 = vmul.f32 %v521_v38, %v45_v22  ;;  %v67_v1 = vld [vmem:[%s784_s0 + $0x1b0] sm:$0xff]  ;;  %v69_v7 = vld [vmem:[%s784_s0 + $0x1c0] sm:$0xff] }
  0x94   :  { %238 = vst [vmem:[%s785_s2 + $0x78] sm:$0xff] %v174_v21  ;;  %239 = vst [vmem:[%s785_s2 + $0x80] sm:$0xff] %v175_v26  ;;  %v120_v60 = vmul.f32 %v521_v38, %v46_v23  ;;  %v121_v61 = vmul.f32 %v521_v38, %v47_v24  ;;  %v122_v62 = vmul.f32 %v521_v38, %v48_v25  ;;  %v70_v8 = vld [vmem:[%s784_s0 + $0x1c8] sm:$0xff]  ;;  %v71_v13 = vld [vmem:[%s784_s0 + $0x1d0] sm:$0xff] }
  0x95   :  { %240 = vst [vmem:[%s785_s2 + $0x88] sm:$0xff] %v176_v27  ;;  %241 = vst [vmem:[%s785_s2 + $0x90] sm:$0xff] %v177_v28  ;;  %v123_v2 = vmul.f32 %v521_v38, %v49_v30  ;;  %v124_v3 = vmul.f32 %v521_v38, %v50_v31  ;;  %v125_v4 = vmul.f32 %v521_v38, %v51_v32  ;;  %v72_v14 = vld [vmem:[%s784_s0 + $0x1d8] sm:$0xff]  ;;  %v73_v15 = vld [vmem:[%s784_s0 + $0x1e0] sm:$0xff] }
  0x96   :  { %242 = vst [vmem:[%s785_s2 + $0x98] sm:$0xff] %v178_v29  ;;  %243 = vst [vmem:[%s785_s2 + $0xa0] sm:$0xff] %v179_v34  ;;  %v126_v5 = vmul.f32 %v521_v38, %v52_v33  ;;  %v127_v9 = vmul.f32 %v521_v38, %v53_v39  ;;  %v128_v10 = vmul.f32 %v521_v38, %v54_v40  ;;  %v74_v20 = vld [vmem:[%s784_s0 + $0x1e8] sm:$0xff]  ;;  %v75_v21 = vld [vmem:[%s784_s0 + $0x1f0] sm:$0xff] }
  0x97   :  { %244 = vst [vmem:[%s785_s2 + $0xa8] sm:$0xff] %v180_v35  ;;  %245 = vst [vmem:[%s785_s2 + $0xb0] sm:$0xff] %v181_v36  ;;  %v129_v11 = vmul.f32 %v521_v38, %v55_v41  ;;  %v130_v12 = vmul.f32 %v521_v38, %v56_v46  ;;  %v131_v16 = vmul.f32 %v521_v38, %v57_v47  ;;  %v76_v22 = vld [vmem:[%s784_s0 + $0x1f8] sm:$0xff]  ;;  %v157_v35 = vpop.permute.xlu1 %156 }
  0x98   :  { %246 = vst [vmem:[%s785_s2 + $0xb8] sm:$0xff] %v182_v37  ;;  %247 = vst [vmem:[%s785_s2 + $0xc0] sm:$0xff] %v183_v42  ;;  %v132_v17 = vmul.f32 %v521_v38, %v58_v48  ;;  %v133_v18 = vmul.f32 %v521_v38, %v59_v53  ;;  %v134_v19 = vmul.f32 %v521_v38, %v60_v54 }
  0x99   :  { %248 = vst [vmem:[%s785_s2 + $0xc8] sm:$0xff] %v184_v43  ;;  %249 = vst [vmem:[%s785_s2 + $0xd0] sm:$0xff] %v185_v44  ;;  %v135_v23 = vmul.f32 %v521_v38, %v61_v55  ;;  %v136_v24 = vmul.f32 %v521_v38, %v62_v56  ;;  %v137_v25 = vmul.f32 %v521_v38, %v63_v57 }
  0x9a   :  { %250 = vst [vmem:[%s785_s2 + $0xd8] sm:$0xff] %v186_v45  ;;  %251 = vst [vmem:[%s785_s2 + $0xe0] sm:$0xff] %v187_v49  ;;  %v138_v26 = vmul.f32 %v521_v38, %v64_v58  ;;  %v139_v27 = vmul.f32 %v521_v38, %v65_v63  ;;  %v140_v28 = vmul.f32 %v521_v38, %v66_v0 }
  0x9b   :  { %252 = vst [vmem:[%s785_s2 + $0xe8] sm:$0xff] %v188_v50  ;;  %253 = vst [vmem:[%s785_s2 + $0xf0] sm:$0xff] %v189_v51  ;;  %v141_v29 = vmul.f32 %v521_v38, %v67_v1  ;;  %v142_v30 = vmul.f32 %v521_v38, %v68_v6  ;;  %v143_v31 = vmul.f32 %v521_v38, %v69_v7 }
  0x9c   :  { %254 = vst [vmem:[%s785_s2 + $0xf8] sm:$0xff] %v190_v52  ;;  %v144_v32 = vmul.f32 %v521_v38, %v70_v8  ;;  %v145_v33 = vmul.f32 %v521_v38, %v71_v13  ;;  %v146_v34 = vmul.f32 %v521_v38, %v72_v14  ;;  %v147_v36 = vmul.f32 %v521_v38, %v73_v15 }
  0x9d   :  { %v148_v37 = vmul.f32 %v521_v38, %v74_v20  ;;  %v149_v39 = vmul.f32 %v521_v38, %v75_v21  ;;  %v150_v40 = vmul.f32 %v521_v38, %v76_v22  ;;  %v191_v41 = vadd.f32 %v157_v35, %v119_v59 }
  0x9e   :  { %v192_v42 = vadd.f32 %v157_v35, %v120_v60  ;;  %v193_v43 = vadd.f32 %v157_v35, %v121_v61  ;;  %v194_v44 = vadd.f32 %v157_v35, %v122_v62  ;;  %v195_v45 = vadd.f32 %v157_v35, %v123_v2 }
  0x9f   :  { %v196_v46 = vadd.f32 %v157_v35, %v124_v3  ;;  %v197_v47 = vadd.f32 %v157_v35, %v125_v4  ;;  %v198_v48 = vadd.f32 %v157_v35, %v126_v5  ;;  %v199_v49 = vadd.f32 %v157_v35, %v127_v9  ;;  %255 = vst [vmem:[%s785_s2 + $0x100] sm:$0xff] %v191_v41 }
  0xa0   :  { %v200_v50 = vadd.f32 %v157_v35, %v128_v10  ;;  %v201_v51 = vadd.f32 %v157_v35, %v129_v11  ;;  %v202_v52 = vadd.f32 %v157_v35, %v130_v12  ;;  %256 = vst [vmem:[%s785_s2 + $0x108] sm:$0xff] %v192_v42  ;;  %257 = vst [vmem:[%s785_s2 + $0x110] sm:$0xff] %v193_v43 }
  0xa1   :  { %258 = vst [vmem:[%s785_s2 + $0x118] sm:$0xff] %v194_v44  ;;  %v203_v38 = vadd.f32 %v157_v35, %v131_v16  ;;  %v204_v53 = vadd.f32 %v157_v35, %v132_v17  ;;  %v205_v54 = vadd.f32 %v157_v35, %v133_v18  ;;  %v206_v55 = vadd.f32 %v157_v35, %v134_v19 }
  0xa2   :  { %259 = vst [vmem:[%s785_s2 + $0x120] sm:$0xff] %v195_v45  ;;  %260 = vst [vmem:[%s785_s2 + $0x128] sm:$0xff] %v196_v46  ;;  %v207_v56 = vadd.f32 %v157_v35, %v135_v23  ;;  %v208_v57 = vadd.f32 %v157_v35, %v136_v24  ;;  %v209_v58 = vadd.f32 %v157_v35, %v137_v25 }
  0xa3   :  { %261 = vst [vmem:[%s785_s2 + $0x130] sm:$0xff] %v197_v47  ;;  %262 = vst [vmem:[%s785_s2 + $0x138] sm:$0xff] %v198_v48  ;;  %v210_v59 = vadd.f32 %v157_v35, %v138_v26  ;;  %v211_v60 = vadd.f32 %v157_v35, %v139_v27  ;;  %v212_v61 = vadd.f32 %v157_v35, %v140_v28 }
  0xa4   :  { %263 = vst [vmem:[%s785_s2 + $0x140] sm:$0xff] %v199_v49  ;;  %264 = vst [vmem:[%s785_s2 + $0x148] sm:$0xff] %v200_v50  ;;  %v213_v62 = vadd.f32 %v157_v35, %v141_v29  ;;  %v214_v63 = vadd.f32 %v157_v35, %v142_v30  ;;  %v215_v0 = vadd.f32 %v157_v35, %v143_v31 }
  0xa5   :  { %265 = vst [vmem:[%s785_s2 + $0x150] sm:$0xff] %v201_v51  ;;  %266 = vst [vmem:[%s785_s2 + $0x158] sm:$0xff] %v202_v52  ;;  %v216_v1 = vadd.f32 %v157_v35, %v144_v32  ;;  %v217_v2 = vadd.f32 %v157_v35, %v145_v33  ;;  %v218_v3 = vadd.f32 %v157_v35, %v146_v34 }
  0xa6   :  { %267 = vst [vmem:[%s785_s2 + $0x160] sm:$0xff] %v203_v38  ;;  %268 = vst [vmem:[%s785_s2 + $0x168] sm:$0xff] %v204_v53  ;;  %v219_v4 = vadd.f32 %v157_v35, %v147_v36  ;;  %v220_v5 = vadd.f32 %v157_v35, %v148_v37  ;;  %v221_v6 = vadd.f32 %v157_v35, %v149_v39 }
  0xa7   :  { %269 = vst [vmem:[%s785_s2 + $0x170] sm:$0xff] %v205_v54  ;;  %270 = vst [vmem:[%s785_s2 + $0x178] sm:$0xff] %v206_v55  ;;  %v222_v7 = vadd.f32 %v157_v35, %v150_v40 }
  0xa8   :  { %271 = vst [vmem:[%s785_s2 + $0x180] sm:$0xff] %v207_v56  ;;  %272 = vst [vmem:[%s785_s2 + $0x188] sm:$0xff] %v208_v57 }
  0xa9   :  { %273 = vst [vmem:[%s785_s2 + $0x190] sm:$0xff] %v209_v58  ;;  %274 = vst [vmem:[%s785_s2 + $0x198] sm:$0xff] %v210_v59 }
  0xaa   :  { %275 = vst [vmem:[%s785_s2 + $0x1a0] sm:$0xff] %v211_v60  ;;  %276 = vst [vmem:[%s785_s2 + $0x1a8] sm:$0xff] %v212_v61 }
  0xab   :  { %277 = vst [vmem:[%s785_s2 + $0x1b0] sm:$0xff] %v213_v62  ;;  %278 = vst [vmem:[%s785_s2 + $0x1b8] sm:$0xff] %v214_v63 }
  0xac   :  { %279 = vst [vmem:[%s785_s2 + $0x1c0] sm:$0xff] %v215_v0  ;;  %280 = vst [vmem:[%s785_s2 + $0x1c8] sm:$0xff] %v216_v1 }
  0xad   :  { %281 = vst [vmem:[%s785_s2 + $0x1d0] sm:$0xff] %v217_v2  ;;  %282 = vst [vmem:[%s785_s2 + $0x1d8] sm:$0xff] %v218_v3 }
  0xae   :  { %283 = vst [vmem:[%s785_s2 + $0x1e0] sm:$0xff] %v219_v4  ;;  %284 = vst [vmem:[%s785_s2 + $0x1e8] sm:$0xff] %v220_v5 }
  0xaf   :  { %285 = vst [vmem:[%s785_s2 + $0x1f0] sm:$0xff] %v221_v6  ;;  %286 = vst [vmem:[%s785_s2 + $0x1f8] sm:$0xff] %v222_v7 }

// kernel: switch_norm_3d.2
= control target key start
LH: loop header
LB: loop body
LE: loop exit
PB: predicated region body
PF: predicated region fallthrough
CT: control target
= control target key end

     0   :  { %vm34_vm0 = vcmask 15360   ;;  %vm299_vm1 = vcmask 7168   ;;  %s543_s0 = inlined_call_operand.vmem [shape: f32[16,4096], index: 0, kind: input, shape index: {}]   ;;  %s544_s1 = inlined_call_operand.vmem [shape: f32[1,16,2], index: 1, kind: output, shape index: {}]  }
   0x1   :  { %v37_v0 = vld [vmem:[%s543_s0] sm:$0xff]  ;;  %v38_v1 = vld [vmem:[%s543_s0 + $0x8] sm:$0xff]  ;;  %v39_v2 = vld [vmem:[%s543_s0 + $0x10] sm:$0xff] }
   0x2   :  { %v40_v3 = vld [vmem:[%s543_s0 + $0x18] sm:$0xff]  ;;  %v167_v4 = vmul.f32 %v37_v0, %v37_v0  ;;  %v168_v5 = vmul.f32 %v38_v1, %v38_v1  ;;  %v169_v6 = vmul.f32 %v39_v2, %v39_v2  ;;  %v101_v7 = vadd.f32 %v38_v1, %v37_v0  ;;  %v41_v8 = vld [vmem:[%s543_s0 + $0x20] sm:$0xff]  ;;  %v42_v11 = vld [vmem:[%s543_s0 + $0x28] sm:$0xff] }
   0x3   :  { %v170_v9 = vmul.f32 %v40_v3, %v40_v3  ;;  %v171_v13 = vmul.f32 %v41_v8, %v41_v8  ;;  %v43_v15 = vld [vmem:[%s543_s0 + $0x30] sm:$0xff]  ;;  %v172_v17 = vmul.f32 %v42_v11, %v42_v11  ;;  %v44_v19 = vld [vmem:[%s543_s0 + $0x38] sm:$0xff]  ;;  %v45_v23 = vld [vmem:[%s543_s0 + $0x40] sm:$0xff] }
   0x4   :  { %v231_v10 = vadd.f32 %v168_v5, %v167_v4  ;;  %v102_v12 = vadd.f32 %v101_v7, %v39_v2  ;;  %v173_v21 = vmul.f32 %v43_v15, %v43_v15  ;;  %v174_v25 = vmul.f32 %v44_v19, %v44_v19  ;;  %v46_v27 = vld [vmem:[%s543_s0 + $0x48] sm:$0xff]  ;;  %v47_v31 = vld [vmem:[%s543_s0 + $0x50] sm:$0xff]  ;;  %v69_v35 = vld [vmem:[%s543_s0 + $0x100] sm:$0xff] }
   0x5   :  { %v175_v29 = vmul.f32 %v45_v23, %v45_v23  ;;  %v176_v33 = vmul.f32 %v46_v27, %v46_v27  ;;  %v70_v36 = vld [vmem:[%s543_s0 + $0x108] sm:$0xff]  ;;  %v48_v37 = vld [vmem:[%s543_s0 + $0x58] sm:$0xff]  ;;  %v177_v39 = vmul.f32 %v47_v31, %v47_v31  ;;  %v71_v41 = vld [vmem:[%s543_s0 + $0x110] sm:$0xff]  ;;  %v199_v44 = vmul.f32 %v69_v35, %v69_v35 }
   0x6   :  { %v232_v14 = vadd.f32 %v231_v10, %v169_v6  ;;  %v103_v16 = vadd.f32 %v102_v12, %v40_v3  ;;  %v49_v42 = vld [vmem:[%s543_s0 + $0x60] sm:$0xff]  ;;  %v200_v45 = vmul.f32 %v70_v36, %v70_v36  ;;  %v178_v46 = vmul.f32 %v48_v37, %v48_v37  ;;  %v72_v48 = vld [vmem:[%s543_s0 + $0x118] sm:$0xff]  ;;  %v50_v49 = vld [vmem:[%s543_s0 + $0x68] sm:$0xff] }
   0x7   :  { %v201_v51 = vmul.f32 %v71_v41, %v71_v41  ;;  %v179_v52 = vmul.f32 %v49_v42, %v49_v42  ;;  %v73_v54 = vld [vmem:[%s543_s0 + $0x120] sm:$0xff]  ;;  %v51_v55 = vld [vmem:[%s543_s0 + $0x70] sm:$0xff]  ;;  %v202_v57 = vmul.f32 %v72_v48, %v72_v48  ;;  %v134_v59 = vadd.f32 %v70_v36, %v69_v35  ;;  %v74_v62 = vld [vmem:[%s543_s0 + $0x128] sm:$0xff] }
   0x8   :  { %v233_v18 = vadd.f32 %v232_v14, %v170_v9  ;;  %v104_v20 = vadd.f32 %v103_v16, %v41_v8  ;;  %v264_v58 = vadd.f32 %v200_v45, %v199_v44  ;;  %v180_v60 = vmul.f32 %v50_v49, %v50_v49  ;;  %v52_v63 = vld [vmem:[%s543_s0 + $0x78] sm:$0xff]  ;;  %v75_v6 = vld [vmem:[%s543_s0 + $0x130] sm:$0xff]  ;;  %v53_v7 = vld [vmem:[%s543_s0 + $0x80] sm:$0xff] }
   0x9   :  { %v203_v1 = vmul.f32 %v73_v54, %v73_v54  ;;  %v135_v3 = vadd.f32 %v134_v59, %v71_v41  ;;  %v181_v4 = vmul.f32 %v51_v55, %v51_v55  ;;  %v204_v9 = vmul.f32 %v74_v62, %v74_v62  ;;  %v76_v14 = vld [vmem:[%s543_s0 + $0x138] sm:$0xff] }
   0xa   :  { %v234_v22 = vadd.f32 %v233_v18, %v171_v13  ;;  %v105_v24 = vadd.f32 %v104_v20, %v42_v11  ;;  %v265_v2 = vadd.f32 %v264_v58, %v201_v51  ;;  %v182_v12 = vmul.f32 %v52_v63, %v52_v63 }
   0xb   :  { %v136_v11 = vadd.f32 %v135_v3, %v72_v48  ;;  %v183_v20 = vmul.f32 %v53_v7, %v53_v7 }
   0xc   :  { %v235_v26 = vadd.f32 %v234_v22, %v172_v17  ;;  %v106_v28 = vadd.f32 %v105_v24, %v43_v15  ;;  %v266_v10 = vadd.f32 %v265_v2, %v202_v57  ;;  %v54_v15 = vld [vmem:[%s543_s0 + $0x88] sm:$0xff]  ;;  %v205_v17 = vmul.f32 %v75_v6, %v75_v6  ;;  %v77_v22 = vld [vmem:[%s543_s0 + $0x140] sm:$0xff] }
   0xe   :  { %v236_v30 = vadd.f32 %v235_v26, %v173_v21  ;;  %v107_v32 = vadd.f32 %v106_v28, %v44_v19  ;;  %v267_v18 = vadd.f32 %v266_v10, %v203_v1  ;;  %v137_v19 = vadd.f32 %v136_v11, %v73_v54  ;;  %v81_v54 = vld [vmem:[%s543_s0 + $0x160] sm:$0xff] }
   0xf   :  { %v184_v28 = vmul.f32 %v54_v15, %v54_v15  ;;  %v211_v1 = vmul.f32 %v81_v54, %v81_v54 }
  0x10   :  { %v237_v34 = vadd.f32 %v236_v30, %v174_v25  ;;  %v108_v38 = vadd.f32 %v107_v32, %v45_v23  ;;  %v55_v23 = vld [vmem:[%s543_s0 + $0x90] sm:$0xff]  ;;  %v206_v25 = vmul.f32 %v76_v14, %v76_v14  ;;  %v268_v26 = vadd.f32 %v267_v18, %v204_v9  ;;  %v78_v30 = vld [vmem:[%s543_s0 + $0x148] sm:$0xff] }
  0x11   :  { %v185_v36 = vmul.f32 %v55_v23, %v55_v23  ;;  %v208_v41 = vmul.f32 %v78_v30, %v78_v30 }
  0x12   :  { %v238_v40 = vadd.f32 %v237_v34, %v175_v29  ;;  %v109_v43 = vadd.f32 %v108_v38, %v46_v27  ;;  %v138_v27 = vadd.f32 %v137_v19, %v74_v62  ;;  %v269_v34 = vadd.f32 %v268_v26, %v205_v17  ;;  %v79_v38 = vld [vmem:[%s543_s0 + $0x150] sm:$0xff]  ;;  %v82_v62 = vld [vmem:[%s543_s0 + $0x168] sm:$0xff] }
  0x13   :  { %v212_v9 = vmul.f32 %v82_v62, %v82_v62 }
  0x14   :  { %v239_v47 = vadd.f32 %v238_v40, %v176_v33  ;;  %v110_v50 = vadd.f32 %v109_v43, %v47_v31  ;;  %v56_v31 = vld [vmem:[%s543_s0 + $0x98] sm:$0xff]  ;;  %v207_v33 = vmul.f32 %v77_v22, %v77_v22  ;;  %v139_v35 = vadd.f32 %v138_v27, %v75_v6  ;;  %v83_v6 = vld [vmem:[%s543_s0 + $0x170] sm:$0xff] }
  0x15   :  { %v186_v44 = vmul.f32 %v56_v31, %v56_v31  ;;  %v213_v17 = vmul.f32 %v83_v6, %v83_v6 }
  0x16   :  { %v240_v53 = vadd.f32 %v239_v47, %v177_v39  ;;  %v111_v56 = vadd.f32 %v110_v50, %v48_v37  ;;  %v57_v39 = vld [vmem:[%s543_s0 + $0xa0] sm:$0xff]  ;;  %v140_v43 = vadd.f32 %v139_v35, %v76_v14  ;;  %v58_v47 = vld [vmem:[%s543_s0 + $0xa8] sm:$0xff]  ;;  %v84_v14 = vld [vmem:[%s543_s0 + $0x178] sm:$0xff] }
  0x18   :  { %v241_v61 = vadd.f32 %v240_v53, %v178_v46  ;;  %v112_v0 = vadd.f32 %v111_v56, %v49_v42  ;;  %v270_v42 = vadd.f32 %v269_v34, %v206_v25  ;;  %v80_v46 = vld [vmem:[%s543_s0 + $0x158] sm:$0xff]  ;;  %v141_v51 = vadd.f32 %v140_v43, %v77_v22  ;;  %v85_v22 = vld [vmem:[%s543_s0 + $0x180] sm:$0xff] }
  0x19   :  { %v210_v57 = vmul.f32 %v80_v46, %v80_v46  ;;  %v214_v25 = vmul.f32 %v84_v14, %v84_v14 }
  0x1a   :  { %v242_v5 = vadd.f32 %v241_v61, %v179_v52  ;;  %v113_v8 = vadd.f32 %v112_v0, %v50_v49  ;;  %v209_v49 = vmul.f32 %v79_v38, %v79_v38  ;;  %v271_v50 = vadd.f32 %v270_v42, %v207_v33 }
  0x1b   :  { %v187_v52 = vmul.f32 %v57_v39, %v57_v39  ;;  %v142_v59 = vadd.f32 %v141_v51, %v78_v30  ;;  %v86_v30 = vld [vmem:[%s543_s0 + $0x188] sm:$0xff]  ;;  %v215_v33 = vmul.f32 %v85_v22, %v85_v22 }
  0x1c   :  { %v243_v13 = vadd.f32 %v242_v5, %v180_v60  ;;  %v114_v16 = vadd.f32 %v113_v8, %v51_v55  ;;  %v59_v55 = vld [vmem:[%s543_s0 + $0xb0] sm:$0xff]  ;;  %v272_v58 = vadd.f32 %v271_v50, %v208_v41  ;;  %v188_v60 = vmul.f32 %v58_v47, %v58_v47 }
  0x1d   :  { %v143_v3 = vadd.f32 %v142_v59, %v79_v38  ;;  %v87_v38 = vld [vmem:[%s543_s0 + $0x190] sm:$0xff]  ;;  %v216_v41 = vmul.f32 %v86_v30, %v86_v30 }
  0x1e   :  { %v244_v21 = vadd.f32 %v243_v13, %v181_v4  ;;  %v115_v24 = vadd.f32 %v114_v16, %v52_v63  ;;  %v60_v63 = vld [vmem:[%s543_s0 + $0xb8] sm:$0xff]  ;;  %v273_v2 = vadd.f32 %v272_v58, %v209_v49  ;;  %v189_v4 = vmul.f32 %v59_v55, %v59_v55 }
  0x1f   :  { %v144_v11 = vadd.f32 %v143_v3, %v80_v46  ;;  %v88_v46 = vld [vmem:[%s543_s0 + $0x198] sm:$0xff]  ;;  %v217_v49 = vmul.f32 %v87_v38, %v87_v38 }
  0x20   :  { %v245_v29 = vadd.f32 %v244_v21, %v182_v12  ;;  %v116_v32 = vadd.f32 %v115_v24, %v53_v7  ;;  %v61_v7 = vld [vmem:[%s543_s0 + $0xc0] sm:$0xff]  ;;  %v274_v10 = vadd.f32 %v273_v2, %v210_v57  ;;  %v190_v12 = vmul.f32 %v60_v63, %v60_v63 }
  0x21   :  { %v145_v19 = vadd.f32 %v144_v11, %v81_v54  ;;  %v89_v54 = vld [vmem:[%s543_s0 + $0x1a0] sm:$0xff]  ;;  %v218_v57 = vmul.f32 %v88_v46, %v88_v46 }
  0x22   :  { %v246_v37 = vadd.f32 %v245_v29, %v183_v20  ;;  %v117_v40 = vadd.f32 %v116_v32, %v54_v15  ;;  %v62_v15 = vld [vmem:[%s543_s0 + $0xc8] sm:$0xff]  ;;  %v275_v18 = vadd.f32 %v274_v10, %v211_v1  ;;  %v191_v20 = vmul.f32 %v61_v7, %v61_v7 }
  0x23   :  { %v146_v27 = vadd.f32 %v145_v19, %v82_v62  ;;  %v90_v62 = vld [vmem:[%s543_s0 + $0x1a8] sm:$0xff]  ;;  %v219_v1 = vmul.f32 %v89_v54, %v89_v54  ;;  %v93_v19 = vld [vmem:[%s543_s0 + $0x1c0] sm:$0xff] }
  0x24   :  { %v247_v45 = vadd.f32 %v246_v37, %v184_v28  ;;  %v118_v48 = vadd.f32 %v117_v40, %v55_v23  ;;  %v63_v23 = vld [vmem:[%s543_s0 + $0xd0] sm:$0xff]  ;;  %v276_v26 = vadd.f32 %v275_v18, %v212_v9  ;;  %v192_v28 = vmul.f32 %v62_v15, %v62_v15 }
  0x25   :  { %v147_v35 = vadd.f32 %v146_v27, %v83_v6  ;;  %v91_v6 = vld [vmem:[%s543_s0 + $0x1b0] sm:$0xff] }
  0x26   :  { %v248_v53 = vadd.f32 %v247_v45, %v185_v36  ;;  %v119_v56 = vadd.f32 %v118_v48, %v56_v31  ;;  %v64_v31 = vld [vmem:[%s543_s0 + $0xd8] sm:$0xff]  ;;  %v277_v34 = vadd.f32 %v276_v26, %v213_v17  ;;  %v193_v36 = vmul.f32 %v63_v23, %v63_v23 }
  0x27   :  { %v148_v43 = vadd.f32 %v147_v35, %v84_v14  ;;  %v223_v26 = vmul.f32 %v93_v19, %v93_v19 }
  0x28   :  { %v249_v61 = vadd.f32 %v248_v53, %v186_v44  ;;  %v120_v0 = vadd.f32 %v119_v56, %v57_v39  ;;  %v65_v39 = vld [vmem:[%s543_s0 + $0xe0] sm:$0xff]  ;;  %v278_v42 = vadd.f32 %v277_v34, %v214_v25  ;;  %v194_v44 = vmul.f32 %v64_v31, %v64_v31  ;;  %v94_v25 = vld [vmem:[%s543_s0 + $0x1c8] sm:$0xff] }
  0x29   :  { %v149_v51 = vadd.f32 %v148_v43, %v85_v22 }
  0x2a   :  { %v250_v5 = vadd.f32 %v249_v61, %v187_v52  ;;  %v121_v8 = vadd.f32 %v120_v0, %v58_v47  ;;  %v66_v47 = vld [vmem:[%s543_s0 + $0xe8] sm:$0xff]  ;;  %v279_v50 = vadd.f32 %v278_v42, %v215_v33  ;;  %v195_v52 = vmul.f32 %v65_v39, %v65_v39  ;;  %v96_v33 = vld [vmem:[%s543_s0 + $0x1d8] sm:$0xff] }
  0x2b   :  { %v150_v59 = vadd.f32 %v149_v51, %v86_v30  ;;  %v224_v30 = vmul.f32 %v94_v25, %v94_v25 }
  0x2c   :  { %v251_v13 = vadd.f32 %v250_v5, %v188_v60  ;;  %v122_v16 = vadd.f32 %v121_v8, %v59_v55  ;;  %v67_v55 = vld [vmem:[%s543_s0 + $0xf0] sm:$0xff]  ;;  %v280_v58 = vadd.f32 %v279_v50, %v216_v41  ;;  %v196_v60 = vmul.f32 %v66_v47, %v66_v47  ;;  %v98_v41 = vld [vmem:[%s543_s0 + $0x1e8] sm:$0xff] }
  0x2d   :  { %v151_v3 = vadd.f32 %v150_v59, %v87_v38  ;;  %v220_v8 = vmul.f32 %v90_v62, %v90_v62  ;;  %v226_v38 = vmul.f32 %v96_v33, %v96_v33 }
  0x2e   :  { %v252_v21 = vadd.f32 %v251_v13, %v189_v4  ;;  %v123_v24 = vadd.f32 %v122_v16, %v60_v63  ;;  %v68_v63 = vld [vmem:[%s543_s0 + $0xf8] sm:$0xff]  ;;  %v281_v2 = vadd.f32 %v280_v58, %v217_v49  ;;  %v197_v4 = vmul.f32 %v67_v55, %v67_v55 }
  0x2f   :  { %v152_v10 = vadd.f32 %v151_v3, %v88_v46  ;;  %v198_v11 = vmul.f32 %v68_v63, %v68_v63  ;;  %v92_v13 = vld [vmem:[%s543_s0 + $0x1b8] sm:$0xff] }
  0x30   :  { %v253_v29 = vadd.f32 %v252_v21, %v190_v12  ;;  %v124_v32 = vadd.f32 %v123_v24, %v61_v7  ;;  %v282_v9 = vadd.f32 %v281_v2, %v218_v57  ;;  %v222_v21 = vmul.f32 %v92_v13, %v92_v13  ;;  %v100_v46 = vld [vmem:[%s543_s0 + $0x1f8] sm:$0xff] }
  0x31   :  { %v153_v17 = vadd.f32 %v152_v10, %v89_v54 }
  0x32   :  { %v254_v37 = vadd.f32 %v253_v29, %v191_v20  ;;  %v125_v40 = vadd.f32 %v124_v32, %v62_v15  ;;  %v221_v15 = vmul.f32 %v91_v6, %v91_v6  ;;  %v283_v16 = vadd.f32 %v282_v9, %v219_v1  ;;  %v95_v29 = vld [vmem:[%s543_s0 + $0x1d0] sm:$0xff] }
  0x33   :  { %v225_v34 = vmul.f32 %v95_v29, %v95_v29 }
  0x34   :  { %v255_v45 = vadd.f32 %v254_v37, %v192_v28  ;;  %v126_v48 = vadd.f32 %v125_v40, %v63_v23  ;;  %v284_v22 = vadd.f32 %v283_v16, %v220_v8  ;;  %v154_v23 = vadd.f32 %v153_v17, %v90_v62  ;;  %v97_v37 = vld [vmem:[%s543_s0 + $0x1e0] sm:$0xff] }
  0x35   :  { %v227_v42 = vmul.f32 %v97_v37, %v97_v37 }
  0x36   :  { %v256_v53 = vadd.f32 %v255_v45, %v193_v36  ;;  %v127_v56 = vadd.f32 %v126_v48, %v64_v31  ;;  %v285_v27 = vadd.f32 %v284_v22, %v221_v15  ;;  %v155_v28 = vadd.f32 %v154_v23, %v91_v6  ;;  %v99_v45 = vld [vmem:[%s543_s0 + $0x1f0] sm:$0xff] }
  0x37   :  { %v229_v50 = vmul.f32 %v99_v45, %v99_v45 }
  0x38   :  { %v257_v61 = vadd.f32 %v256_v53, %v194_v44  ;;  %v128_v0 = vadd.f32 %v127_v56, %v65_v39  ;;  %v286_v31 = vadd.f32 %v285_v27, %v222_v21  ;;  %v156_v32 = vadd.f32 %v155_v28, %v92_v13 }
  0x39   :  { %v230_v53 = vmul.f32 %v100_v46, %v100_v46  ;;  %v318_v56 = vmov 0.0  }
  0x3a   :  { %v258_v5 = vadd.f32 %v257_v61, %v195_v52  ;;  %v129_v7 = vadd.f32 %v128_v0, %v66_v47  ;;  %v287_v35 = vadd.f32 %v286_v31, %v223_v26  ;;  %v157_v36 = vadd.f32 %v156_v32, %v93_v19  ;;  %35 = vst.msk [vmem:[%s544_s1] sm:$0xff] %vm34_vm0, %v318_v56 }
  0x3b   :  { %v228_v47 = vmul.f32 %v98_v41, %v98_v41  ;;  %36 = vst.msk [vmem:[%s544_s1 + $0x8] sm:$0xff] %vm34_vm0, %v318_v56 }
  0x3c   :  { %v259_v12 = vadd.f32 %v258_v5, %v196_v60  ;;  %v130_v14 = vadd.f32 %v129_v7, %v67_v55  ;;  %v288_v39 = vadd.f32 %v287_v35, %v224_v30  ;;  %v158_v40 = vadd.f32 %v157_v36, %v94_v25 }
  0x3e   :  { %v260_v18 = vadd.f32 %v259_v12, %v197_v4  ;;  %v131_v20 = vadd.f32 %v130_v14, %v68_v63  ;;  %v289_v43 = vadd.f32 %v288_v39, %v225_v34  ;;  %v159_v44 = vadd.f32 %v158_v40, %v95_v29 }
  0x40   :  { %v261_v24 = vadd.f32 %v260_v18, %v198_v11  ;;  %132 = vadd.xlane.f32.xlu0 %v131_v20  ;;  %v290_v48 = vadd.f32 %v289_v43, %v226_v38  ;;  %v160_v49 = vadd.f32 %v159_v44, %v96_v33 }
  0x41   :  { %v297_v61 = vld [vmem:[%s544_s1] sm:$0xff] }
  0x42   :  { %262 = vadd.xlane.f32.xlu1 %v261_v24  ;;  %v291_v51 = vadd.f32 %v290_v48, %v227_v42  ;;  %v161_v52 = vadd.f32 %v160_v49, %v97_v37  ;;  %v298_v2 = vld [vmem:[%s544_s1 + $0x8] sm:$0xff] }
  0x44   :  { %v292_v54 = vadd.f32 %v291_v51, %v228_v47  ;;  %v162_v55 = vadd.f32 %v161_v52, %v98_v41 }
  0x46   :  { %v293_v57 = vadd.f32 %v292_v54, %v229_v50  ;;  %v163_v58 = vadd.f32 %v162_v55, %v99_v45 }
  0x48   :  { %v294_v59 = vadd.f32 %v293_v57, %v230_v53  ;;  %v164_v60 = vadd.f32 %v163_v58, %v100_v46 }
  0x4a   :  { %295 = vadd.xlane.f32.xlu1 %v294_v59  ;;  %165 = vadd.xlane.f32.xlu0 %v164_v60 }
  0xcd   :  { %v133_v62 = vpop.xlane.xlu0 %132 }
  0xcf   :  { %v263_v63 = vpop.xlane.xlu1 %262 }
  0xd0   :  { %v300_v0 = vsel %vm299_vm1, %v133_v62, %v263_v63 }
  0xd1   :  { %v302_v1 = vadd.f32 %v300_v0, %v297_v61 }
  0xd3   :  { %305 = vst.msk [vmem:[%s544_s1] sm:$0xff] %vm34_vm0, %v302_v1 }
  0xd7   :  { %v296_v3 = vpop.xlane.xlu1 %295  ;;  %v166_v4 = vpop.xlane.xlu0 %165 }
  0xd8   :  { %v301_v5 = vsel %vm299_vm1, %v166_v4, %v296_v3 }
  0xd9   :  { %v303_v6 = vadd.f32 %v301_v5, %v298_v2 }
  0xdb   :  { %306 = vst.msk [vmem:[%s544_s1 + $0x8] sm:$0xff] %vm34_vm0, %v303_v6 }

</bundles_post_ra>
